<compile_context>
chip_gen: v7x
topology: tpu7x:2x2x1
jax: 0.10.0
libtpu: 0.0.40
codegen_flags: <defaults>
</compile_context>

<pallas_src>
import functools

import jax
import jax.numpy as jnp
from jax.experimental import pallas as pl
from jax.experimental.pallas import tpu as pltpu

HIDDEN = 128


def _round_up(n, m):
    return ((n + m - 1) // m) * m


def _pick_batch_tile(B, block_b):
    """Batch tile: multiple of 8, divides the padded batch, >=2 steps when big."""
    Bp = _round_up(B, 8)                      # minimal sublane padding only
    tb = max(8, min(block_b, Bp))
    if Bp > 16:
        # At least 2 grid steps so the "parallel" grid axis can span both
        # TensorCores on v7x.
        tb = min(tb, _round_up(pl.cdiv(Bp, 2), 8))
    # Shrink to a divisor of Bp: no remainder tile, no large jnp.pad copy.
    while Bp % tb:
        tb -= 8
    return tb, Bp


def _policy_kernel(x_ref, w1_ref, b1_ref, w2_ref, b2_ref, wh_ref, bh_ref,
                   out_ref, *, action_dim):
    compute_dtype = x_ref.dtype
    x = x_ref[...]

    # fc1 + relu  (MXU matmul, f32 accumulation; (1,128) bias broadcasts).
    # f32 operands take Mosaic's full-precision f32 MXU path; bf16 operands
    # (use_bf16=True in the wrapper) take the fast bf16 path.
    h1 = jnp.dot(x, w1_ref[...], preferred_element_type=jnp.float32) + b1_ref[...]
    h1 = jnp.maximum(h1, 0.0)
    if compute_dtype != jnp.float32:
        h1 = h1.astype(compute_dtype)

    # fc2 + relu
    h2 = jnp.dot(h1, w2_ref[...], preferred_element_type=jnp.float32) + b2_ref[...]
    h2 = jnp.maximum(h2, 0.0)
    if compute_dtype != jnp.float32:
        h2 = h2.astype(compute_dtype)

    # Fused heads: one (128, 128) matmul.  Lanes [0, action_dim) are actor
    # logits, lane action_dim is the critic value, remaining lanes padding.
    fused = jnp.dot(h2, wh_ref[...], preferred_element_type=jnp.float32) + bh_ref[...]

    # (1, 128) lane constants only -- no full-tile iota / compares / selects.
    lane = jax.lax.broadcasted_iota(jnp.int32, (1, HIDDEN), 1)
    mask_bias = jnp.where(lane < action_dim, 0.0, -1e30)   # actor lanes pass
    value_sel = (lane == action_dim).astype(jnp.float32)   # picks critic lane

    # Numerically-stable masked softmax over the actor lanes.  Non-actor
    # lanes sit at ~-1e30, so exp underflows to exactly 0 -- no re-masking.
    logits = fused + mask_bias
    m = jnp.max(logits, axis=-1, keepdims=True)
    e = jnp.exp(logits - m)
    denom = jnp.sum(e, axis=-1, keepdims=True)
    probs = e * pl.reciprocal(denom, approx=False)

    # Lane-dense output slab: probs | value | zeros  (unmasked 128-wide stores).
    out_ref[...] = probs + value_sel * fused


def _pack_heads(params, action_dim):
    """Fuse actor/critic into one (HIDDEN, HIDDEN) weight and (1, HIDDEN) bias."""
    wh = jnp.zeros((HIDDEN, HIDDEN), jnp.float32)
    wh = wh.at[:, :action_dim].set(params["wa"])
    wh = wh.at[:, action_dim].set(params["wc"][:, 0])
    bh = jnp.zeros((1, HIDDEN), jnp.float32)
    bh = bh.at[:, :action_dim].set(params["ba"])
    bh = bh.at[:, action_dim].set(params["bc"][:, 0])
    return wh, bh


def policy_forward(x, params, *, block_b=2048, use_bf16=False, return_slab=False):
    """x: (B, state_dim) f32.  Returns (action_probs (B, A), state_value (B, 1)).

    Intended to be called under jit so the tiny pad, head packing and the
    epilogue slices fuse with the pallas_call.  `return_slab=True` returns the
    raw lane-dense (Bp, 128) slab instead (probs in lanes [0, A), value in
    lane A) for consumers that want to avoid the epilogue slices entirely.
    """
    B, state_dim = x.shape
    action_dim = params["wa"].shape[1]
    assert action_dim + 1 <= HIDDEN, "fused-head packing requires action_dim < 128"

    tb, Bp = _pick_batch_tile(B, block_b)
    if Bp != B:
        # Only the minimal (<= 7 row) sublane pad; tb always divides Bp.
        x = jnp.pad(x, ((0, Bp - B), (0, 0)))

    wh, bh = _pack_heads(params, action_dim)
    w1, w2 = params["w1"], params["w2"]
    if use_bf16:
        # Opt-in fast path for v6e/v7x; exceeds the strict 1e-5 parity bound.
        x = x.astype(jnp.bfloat16)
        w1 = w1.astype(jnp.bfloat16)
        w2 = w2.astype(jnp.bfloat16)
        wh = wh.astype(jnp.bfloat16)

    kernel = functools.partial(_policy_kernel, action_dim=action_dim)
    const = lambda i: (0, 0)  # weights/biases resident across all grid steps

    slab = pl.pallas_call(
        kernel,
        out_shape=jax.ShapeDtypeStruct((Bp, HIDDEN), jnp.float32),
        grid=(Bp // tb,),
        in_specs=[
            pl.BlockSpec((tb, state_dim), lambda i: (i, 0)),   # x (batch-tiled)
            pl.BlockSpec((state_dim, HIDDEN), const),          # w1
            pl.BlockSpec((1, HIDDEN), const),                  # b1
            pl.BlockSpec((HIDDEN, HIDDEN), const),             # w2
            pl.BlockSpec((1, HIDDEN), const),                  # b2
            pl.BlockSpec((HIDDEN, HIDDEN), const),             # fused heads W
            pl.BlockSpec((1, HIDDEN), const),                  # fused heads b
        ],
        out_specs=pl.BlockSpec((tb, HIDDEN), lambda i: (i, 0)),
        compiler_params=pltpu.CompilerParams(
            dimension_semantics=("parallel",)),
    )(x, w1, params["b1"], w2, params["b2"], wh, bh)

    if return_slab:
        return slab, action_dim

    probs = slab[:B, :action_dim]
    value = slab[:B, action_dim:action_dim + 1]
    return probs, value


def init_params(key, state_dim, action_dim, hidden=HIDDEN):
    """Deterministic synthetic init (PyTorch-style uniform bounds)."""
    ks = jax.random.split(key, 8)

    def uni(k, shape, fan_in):
        bound = 1.0 / jnp.sqrt(fan_in)
        return jax.random.uniform(k, shape, jnp.float32, -bound, bound)

    return {
        "w1": uni(ks[0], (state_dim, hidden), state_dim),
        "b1": uni(ks[1], (1, hidden), state_dim),
        "w2": uni(ks[2], (hidden, hidden), hidden),
        "b2": uni(ks[3], (1, hidden), hidden),
        "wa": uni(ks[4], (hidden, action_dim), hidden),
        "ba": uni(ks[5], (1, action_dim), hidden),
        "wc": uni(ks[6], (hidden, 1), hidden),
        "bc": uni(ks[7], (1, 1), hidden),
    }


def policy_ref(x, p):
    """Pure-JAX reference for correctness checking."""
    h1 = jnp.maximum(x @ p["w1"] + p["b1"], 0.0)
    h2 = jnp.maximum(h1 @ p["w2"] + p["b2"], 0.0)
    logits = h2 @ p["wa"] + p["ba"]
    probs = jax.nn.softmax(logits, axis=-1)
    value = h2 @ p["wc"] + p["bc"]
    return probs, value


if __name__ == "__main__":
    key = jax.random.PRNGKey(0)
    k_param, k_x1, k_x2 = jax.random.split(key, 3)

    state_dim, action_dim = 32, 8
    params = init_params(k_param, state_dim, action_dim)

    # Jit the whole wrapper so pad / head-packing / epilogue slices fuse.
    fwd = jax.jit(policy_forward)

    # batch=8: single-step grid.  batch=20: exercises the minimal sublane pad
    # and a multi-step grid with resident constant weight blocks.
    for batch, kx in ((8, k_x1), (20, k_x2)):
        x = jax.random.normal(kx, (batch, state_dim), jnp.float32)
        probs, value = fwd(x, params)
        jax.block_until_ready((probs, value))

        probs_ref, value_ref = policy_ref(x, params)
        assert probs.shape == (batch, action_dim)
        assert value.shape == (batch, 1)
        assert jnp.allclose(probs, probs_ref, atol=1e-5, rtol=1e-5)
        assert jnp.allclose(value, value_ref, atol=1e-5, rtol=1e-5)
        assert jnp.allclose(jnp.sum(probs, axis=-1), 1.0, atol=1e-5)

    print("KERNEL_OK")
</pallas_src>

<mosaic_0001>
module attributes {stable_mosaic.version = 11 : i64} {
  func.func @_policy_kernel(%arg0: i32, %arg1: memref<8x32xf32, #tpu.memory_space<vmem>>, %arg2: memref<32x128xf32, #tpu.memory_space<vmem>>, %arg3: memref<1x128xf32, #tpu.memory_space<vmem>>, %arg4: memref<128x128xf32, #tpu.memory_space<vmem>>, %arg5: memref<1x128xf32, #tpu.memory_space<vmem>>, %arg6: memref<128x128xf32, #tpu.memory_space<vmem>>, %arg7: memref<1x128xf32, #tpu.memory_space<vmem>>, %arg8: memref<8x128xf32, #tpu.memory_space<vmem>>) attributes {dimension_semantics = [#tpu.dimension_semantics<parallel>], iteration_bounds = array<i64: 1>, scalar_prefetch = 0 : i64, scratch_operands = 0 : i64, tpu.core_type = #tpu.core_type<tc>, window_params = [{transform_indices = @transform_0, window_bounds = array<i64: 8, 32>}, {pipeline_mode = #tpu.pipeline_mode<synchronous>, transform_indices = @transform_1, window_bounds = array<i64: 32, 128>}, {pipeline_mode = #tpu.pipeline_mode<synchronous>, transform_indices = @transform_2, window_bounds = array<i64: 1, 128>}, {pipeline_mode = #tpu.pipeline_mode<synchronous>, transform_indices = @transform_3, window_bounds = array<i64: 128, 128>}, {pipeline_mode = #tpu.pipeline_mode<synchronous>, transform_indices = @transform_4, window_bounds = array<i64: 1, 128>}, {pipeline_mode = #tpu.pipeline_mode<synchronous>, transform_indices = @transform_5, window_bounds = array<i64: 128, 128>}, {pipeline_mode = #tpu.pipeline_mode<synchronous>, transform_indices = @transform_6, window_bounds = array<i64: 1, 128>}, {transform_indices = @transform_7, window_bounds = array<i64: 8, 128>}]} {
    %c0 = arith.constant 0 : index
    %c0_0 = arith.constant 0 : index
    %0 = vector.load %arg1[%c0, %c0_0] : memref<8x32xf32, #tpu.memory_space<vmem>>, vector<8x32xf32>
    %c0_1 = arith.constant 0 : index
    %c0_2 = arith.constant 0 : index
    %1 = vector.load %arg2[%c0_1, %c0_2] : memref<32x128xf32, #tpu.memory_space<vmem>>, vector<32x128xf32>
    %cst = arith.constant dense<0.000000e+00> : vector<8x128xf32>
    %2 = tpu.matmul %0, %1, %cst {dimension_numbers = #tpu.dot_dimension_numbers<[1], [0], [0], [1], [0, 0, 1, 1], [], []>} : vector<8x32xf32>, vector<32x128xf32>, vector<8x128xf32> -> vector<8x128xf32>
    %c0_3 = arith.constant 0 : index
    %c0_4 = arith.constant 0 : index
    %3 = vector.load %arg3[%c0_3, %c0_4] : memref<1x128xf32, #tpu.memory_space<vmem>>, vector<1x128xf32>
    %4 = vector.broadcast %3 : vector<1x128xf32> to vector<8x128xf32>
    %5 = arith.addf %2, %4 : vector<8x128xf32>
    %cst_5 = arith.constant 0.000000e+00 : f32
    %6 = vector.broadcast %cst_5 : f32 to vector<8x128xf32>
    %7 = arith.maximumf %5, %6 : vector<8x128xf32>
    %c0_6 = arith.constant 0 : index
    %c0_7 = arith.constant 0 : index
    %8 = vector.load %arg4[%c0_6, %c0_7] : memref<128x128xf32, #tpu.memory_space<vmem>>, vector<128x128xf32>
    %cst_8 = arith.constant dense<0.000000e+00> : vector<8x128xf32>
    %9 = tpu.matmul %7, %8, %cst_8 {dimension_numbers = #tpu.dot_dimension_numbers<[1], [0], [0], [1], [0, 0, 1, 1], [], []>} : vector<8x128xf32>, vector<128x128xf32>, vector<8x128xf32> -> vector<8x128xf32>
    %c0_9 = arith.constant 0 : index
    %c0_10 = arith.constant 0 : index
    %10 = vector.load %arg5[%c0_9, %c0_10] : memref<1x128xf32, #tpu.memory_space<vmem>>, vector<1x128xf32>
    %11 = vector.broadcast %10 : vector<1x128xf32> to vector<8x128xf32>
    %12 = arith.addf %9, %11 : vector<8x128xf32>
    %cst_11 = arith.constant 0.000000e+00 : f32
    %13 = vector.broadcast %cst_11 : f32 to vector<8x128xf32>
    %14 = arith.maximumf %12, %13 : vector<8x128xf32>
    %c0_12 = arith.constant 0 : index
    %c0_13 = arith.constant 0 : index
    %15 = vector.load %arg6[%c0_12, %c0_13] : memref<128x128xf32, #tpu.memory_space<vmem>>, vector<128x128xf32>
    %cst_14 = arith.constant dense<0.000000e+00> : vector<8x128xf32>
    %16 = tpu.matmul %14, %15, %cst_14 {dimension_numbers = #tpu.dot_dimension_numbers<[1], [0], [0], [1], [0, 0, 1, 1], [], []>} : vector<8x128xf32>, vector<128x128xf32>, vector<8x128xf32> -> vector<8x128xf32>
    %c0_15 = arith.constant 0 : index
    %c0_16 = arith.constant 0 : index
    %17 = vector.load %arg7[%c0_15, %c0_16] : memref<1x128xf32, #tpu.memory_space<vmem>>, vector<1x128xf32>
    %18 = vector.broadcast %17 : vector<1x128xf32> to vector<8x128xf32>
    %19 = arith.addf %16, %18 : vector<8x128xf32>
    %20 = tpu.iota {dimensions = array<i32: 1>} : vector<1x128xi32>
    %c8_i32 = arith.constant 8 : i32
    %21 = vector.broadcast %c8_i32 : i32 to vector<1x128xi32>
    %22 = arith.cmpi slt, %20, %21 : vector<1x128xi32>
    %cst_17 = arith.constant 0.000000e+00 : f32
    %cst_18 = arith.constant -1.000000e+30 : f32
    %23 = vector.broadcast %cst_17 : f32 to vector<1x128xf32>
    %24 = vector.broadcast %cst_18 : f32 to vector<1x128xf32>
    %25 = arith.select %22, %23, %24 : vector<1x128xi1>, vector<1x128xf32>
    %c8_i32_19 = arith.constant 8 : i32
    %26 = vector.broadcast %c8_i32_19 : i32 to vector<1x128xi32>
    %27 = arith.cmpi eq, %20, %26 : vector<1x128xi32>
    %28 = arith.extui %27 : vector<1x128xi1> to vector<1x128xi32>
    %29 = arith.sitofp %28 : vector<1x128xi32> to vector<1x128xf32>
    %30 = vector.broadcast %25 : vector<1x128xf32> to vector<8x128xf32>
    %31 = arith.addf %19, %30 : vector<8x128xf32>
    %cst_20 = arith.constant dense<0xFF800000> : vector<8xf32>
    %32 = vector.multi_reduction <maximumf>, %31, %cst_20 [1] : vector<8x128xf32> to vector<8xf32>
    %33 = vector.shape_cast %32 : vector<8xf32> to vector<8x1xf32>
    %34 = vector.broadcast %33 : vector<8x1xf32> to vector<8x128xf32>
    %35 = arith.subf %31, %34 : vector<8x128xf32>
    %36 = math.exp %35 : vector<8x128xf32>
    %cst_21 = arith.constant dense<0.000000e+00> : vector<8xf32>
    %37 = vector.multi_reduction <add>, %36, %cst_21 [1] : vector<8x128xf32> to vector<8xf32>
    %38 = vector.shape_cast %37 : vector<8xf32> to vector<8x1xf32>
    %39 = tpu.reciprocal %38 : vector<8x1xf32> -> vector<8x1xf32>
    %40 = vector.broadcast %39 : vector<8x1xf32> to vector<8x128xf32>
    %41 = arith.mulf %36, %40 : vector<8x128xf32>
    %42 = vector.broadcast %29 : vector<1x128xf32> to vector<8x128xf32>
    %43 = arith.mulf %42, %19 : vector<8x128xf32>
    %44 = arith.addf %41, %43 : vector<8x128xf32>
    %c0_22 = arith.constant 0 : index
    %c0_23 = arith.constant 0 : index
    %45 = vector.load %arg8[%c0_22, %c0_23] : memref<8x128xf32, #tpu.memory_space<vmem>>, vector<8x128xf32>
    tpu.vector_store %arg8[%c0_22, %c0_23], %44 {strides = array<i32>} : memref<8x128xf32, #tpu.memory_space<vmem>>, vector<8x128xf32>,
    return
  }
  func.func @transform_0(%arg0: i32) -> (i32, i32) {
    %c0_i32 = arith.constant 0 : i32
    %c0_i32_0 = arith.constant 0 : i32
    return %arg0, %c0_i32 : i32, i32
  }
  func.func @transform_1(%arg0: i32) -> (i32, i32) {
    %c0_i32 = arith.constant 0 : i32
    %c0_i32_0 = arith.constant 0 : i32
    %c0_i32_1 = arith.constant 0 : i32
    return %c0_i32, %c0_i32_0 : i32, i32
  }
  func.func @transform_2(%arg0: i32) -> (i32, i32) {
    %c0_i32 = arith.constant 0 : i32
    %c0_i32_0 = arith.constant 0 : i32
    %c0_i32_1 = arith.constant 0 : i32
    return %c0_i32, %c0_i32_0 : i32, i32
  }
  func.func @transform_3(%arg0: i32) -> (i32, i32) {
    %c0_i32 = arith.constant 0 : i32
    %c0_i32_0 = arith.constant 0 : i32
    %c0_i32_1 = arith.constant 0 : i32
    return %c0_i32, %c0_i32_0 : i32, i32
  }
  func.func @transform_4(%arg0: i32) -> (i32, i32) {
    %c0_i32 = arith.constant 0 : i32
    %c0_i32_0 = arith.constant 0 : i32
    %c0_i32_1 = arith.constant 0 : i32
    return %c0_i32, %c0_i32_0 : i32, i32
  }
  func.func @transform_5(%arg0: i32) -> (i32, i32) {
    %c0_i32 = arith.constant 0 : i32
    %c0_i32_0 = arith.constant 0 : i32
    %c0_i32_1 = arith.constant 0 : i32
    return %c0_i32, %c0_i32_0 : i32, i32
  }
  func.func @transform_6(%arg0: i32) -> (i32, i32) {
    %c0_i32 = arith.constant 0 : i32
    %c0_i32_0 = arith.constant 0 : i32
    %c0_i32_1 = arith.constant 0 : i32
    return %c0_i32, %c0_i32_0 : i32, i32
  }
  func.func @transform_7(%arg0: i32) -> (i32, i32) {
    %c0_i32 = arith.constant 0 : i32
    %c0_i32_0 = arith.constant 0 : i32
    return %arg0, %c0_i32 : i32, i32
  }
}

</mosaic_0001>

<bundles_post_ra>
// kernel: policy_forward.1
= control target key start
LH: loop header
LB: loop body
LE: loop exit
PB: predicated region body
PF: predicated region fallthrough
CT: control target
= control target key end

     0   :  { %v511_v0 = vmov 0.0|0.0   ;;  %vm512_vm0 = vmmov 0   ;;  %v513_v4 = vmov 0.0   ;;  %vm38_vm1 = vcmask 261120   ;;  %s703_s1 = inlined_call_operand.vmem [shape: f32[32,128], index: 1, kind: input, shape index: {}]   ;;  %s704_s3 = inlined_call_operand.vmem [shape: f32[128,128], index: 3, kind: input, shape index: {}]   ;;  %s705_s0 = inlined_call_operand.vmem [shape: f32[8,32], index: 0, kind: input, shape index: {}]   ;;  %s706_s5 = inlined_call_operand.vmem [shape: f32[128,128], index: 5, kind: input, shape index: {}]   ;;  %s707_s2 = inlined_call_operand.vmem [shape: f32[1,128], index: 2, kind: input, shape index: {}]   ;;  %s708_s4 = inlined_call_operand.vmem [shape: f32[1,128], index: 4, kind: input, shape index: {}]   ;;  %s709_s6 = inlined_call_operand.vmem [shape: f32[1,128], index: 6, kind: input, shape index: {}]   ;;  %s710_s7 = inlined_call_operand.vmem [shape: f32[8,128], index: 7, kind: output, shape index: {}]  }
   0x1   :  { %449 = vmatprep.subr.bf16.mxu0 %v511_v0  ;;  %v27_v1 = vld [vmem:[%s703_s1] sm:$0xff]  ;;  %v28_v2 = vld [vmem:[%s703_s1 + $0x8] sm:$0xff]  ;;  %v29_v3 = vld [vmem:[%s703_s1 + $0x10] sm:$0xff]  ;;  %376 = vmatprep.mubr.msk.f32.mxu0 %vm512_vm0, %v513_v4 }
   0x2   :  { %v450_v5 = vpack.c.bf16 %v28_v2, %v27_v1  ;;  %v30_v6 = vld [vmem:[%s703_s1 + $0x18] sm:$0xff]  ;;  %455 = vmatprep.subr.bf16.mxu1 %v511_v0  ;;  %v113_v7 = vld [vmem:[%s704_s3] sm:$0xff]  ;;  %411 = vmatprep.mubr.msk.f32.mxu1 %vm512_vm0, %v513_v4  ;;  %v114_v8 = vld [vmem:[%s704_s3 + $0x8] sm:$0xff] }
   0x3   :  { %v115_v9 = vld [vmem:[%s704_s3 + $0x10] sm:$0xff]  ;;  %v116_v10 = vld [vmem:[%s704_s3 + $0x18] sm:$0xff]  ;;  %v453_v11 = vpack.c.bf16 %v30_v6, %v29_v3  ;;  %v456_v12 = vpack.c.bf16 %v114_v8, %v113_v7  ;;  %v117_v14 = vld [vmem:[%s704_s3 + $0x20] sm:$0xff]  ;;  %v300_v3 = vlaneseq }
   0x4   :  { %451 = vmatpush3.bf16.msra.mxu0 %v450_v5  ;;  %v459_v13 = vpack.c.bf16 %v116_v10, %v115_v9  ;;  %v118_v15 = vld [vmem:[%s704_s3 + $0x28] sm:$0xff]  ;;  %v26_v16 = vld [vmem:[%s705_s0] sm:$0xff]  ;;  %v119_v18 = vld [vmem:[%s704_s3 + $0x30] sm:$0xff]  ;;  %v514_v9 = vmov -1e+30  }
   0x5   :  { %452 = vmatprep.subr.bf16.mxu0 %v511_v0  ;;  %457 = vmatpush3.bf16.msra.mxu1 %v456_v12  ;;  %v462_v17 = vpack.c.bf16 %v118_v15, %v117_v14  ;;  %v120_v19 = vld [vmem:[%s704_s3 + $0x38] sm:$0xff]  ;;  %v121_v21 = vld [vmem:[%s704_s3 + $0x40] sm:$0xff]  ;;  %v122_v22 = vld [vmem:[%s704_s3 + $0x48] sm:$0xff]  ;;  %v301_v5 = vand.u32 127, %v300_v3 }
   0x6   :  { %458 = vmatprep.subr.bf16.mxu1 %v511_v0  ;;  %v465_v20 = vpack.c.bf16 %v120_v19, %v119_v18  ;;  %v468_v23 = vpack.c.bf16 %v122_v22, %v121_v21  ;;  %v123_v24 = vld [vmem:[%s704_s3 + $0x50] sm:$0xff]  ;;  %v124_v25 = vld [vmem:[%s704_s3 + $0x58] sm:$0xff]  ;;  %v125_v27 = vld [vmem:[%s704_s3 + $0x60] sm:$0xff] }
   0x7   :  { %v471_v26 = vpack.c.bf16 %v124_v25, %v123_v24  ;;  %v126_v28 = vld [vmem:[%s704_s3 + $0x68] sm:$0xff]  ;;  %v127_v30 = vld [vmem:[%s704_s3 + $0x70] sm:$0xff]  ;;  %v128_v31 = vld [vmem:[%s704_s3 + $0x78] sm:$0xff]  ;;  %vm304_vm2 = vcmp.eq.s32.totalorder %v301_v5, 8  ;;  %vm302_vm3 = vcmp.lt.s32.totalorder %v301_v5, 8 }
   0x8   :  { %454 = vmatpush3.bf16.msra.mxu0 %v453_v11  ;;  %v474_v29 = vpack.c.bf16 %v126_v28, %v125_v27  ;;  %v477_v32 = vpack.c.bf16 %v128_v31, %v127_v30  ;;  %v207_v33 = vld [vmem:[%s706_s5] sm:$0xff]  ;;  %v208_v34 = vld [vmem:[%s706_s5 + $0x8] sm:$0xff]  ;;  %v209_v35 = vld [vmem:[%s706_s5 + $0x10] sm:$0xff]  ;;  %v328_v8 = vsel %vm304_vm2, 1.0, %v513_v4  ;;  %v303_v10 = vsel %vm302_vm3, 0.0, %v514_v9 }
   0x9   :  { %479 = vmatprep.subr.bf16.mxu0 %v511_v0  ;;  %460 = vmatpush3.bf16.msra.mxu1 %v459_v13  ;;  %v480_v36 = vpack.c.bf16 %v208_v34, %v207_v33  ;;  %v210_v37 = vld [vmem:[%s706_s5 + $0x18] sm:$0xff]  ;;  %v211_v39 = vld [vmem:[%s706_s5 + $0x20] sm:$0xff]  ;;  %v212_v40 = vld [vmem:[%s706_s5 + $0x28] sm:$0xff] }
   0xa   :  { %461 = vmatprep.subr.bf16.mxu1 %v511_v0  ;;  %v483_v38 = vpack.c.bf16 %v210_v37, %v209_v35  ;;  %v486_v41 = vpack.c.bf16 %v212_v40, %v211_v39  ;;  %v213_v42 = vld [vmem:[%s706_s5 + $0x30] sm:$0xff]  ;;  %v214_v43 = vld [vmem:[%s706_s5 + $0x38] sm:$0xff]  ;;  %v215_v45 = vld [vmem:[%s706_s5 + $0x40] sm:$0xff] }
   0xb   :  { %377 = vmatmul.mubr.msk.f32.vlgmr.msra.gmra.mrb[0].mxu0 %vm38_vm1, %v26_v16  ;;  %v489_v44 = vpack.c.bf16 %v214_v43, %v213_v42  ;;  %v216_v46 = vld [vmem:[%s706_s5 + $0x48] sm:$0xff]  ;;  %v217_v48 = vld [vmem:[%s706_s5 + $0x50] sm:$0xff]  ;;  %v218_v49 = vld [vmem:[%s706_s5 + $0x58] sm:$0xff] }
   0xc   :  { %446 = vmatprep.mubr.msk.f32.mxu0 %vm512_vm0, %v513_v4  ;;  %481 = vmatpush3.bf16.msra.mxu0 %v480_v36  ;;  %v492_v47 = vpack.c.bf16 %v216_v46, %v215_v45  ;;  %v495_v50 = vpack.c.bf16 %v218_v49, %v217_v48  ;;  %v219_v51 = vld [vmem:[%s706_s5 + $0x60] sm:$0xff]  ;;  %v220_v52 = vld [vmem:[%s706_s5 + $0x68] sm:$0xff]  ;;  %v221_v59 = vld [vmem:[%s706_s5 + $0x70] sm:$0xff] }
   0xd   :  { %463 = vmatpush3.bf16.msra.mxu1 %v462_v17  ;;  %482 = vmatprep.subr.bf16.mxu0 %v511_v0  ;;  %v498_v53 = vpack.c.bf16 %v220_v52, %v219_v51  ;;  %v324_v54 = vld [vmem:[%s707_s2] ss:$0 sm:$0xff]  ;;  %v222_v60 = vld [vmem:[%s706_s5 + $0x78] sm:$0xff] }
   0xe   :  { %464 = vmatprep.subr.bf16.mxu1 %v511_v0  ;;  %v501_v61 = vpack.c.bf16 %v222_v60, %v221_v59  ;;  %v326_v62 = vld [vmem:[%s708_s4] ss:$0 sm:$0xff] }
   0xf   :  { %v327_v6 = vld [vmem:[%s709_s6] ss:$0 sm:$0xff] }
  0x10   :  { %484 = vmatpush3.bf16.msra.mxu0 %v483_v38 }
  0x11   :  { %466 = vmatpush3.bf16.msra.mxu1 %v465_v20  ;;  %485 = vmatprep.subr.bf16.mxu0 %v511_v0 }
  0x12   :  { %467 = vmatprep.subr.bf16.mxu1 %v511_v0 }
  0x14   :  { %487 = vmatpush3.bf16.msra.mxu0 %v486_v41 }
  0x15   :  { %469 = vmatpush3.bf16.msra.mxu1 %v468_v23  ;;  %488 = vmatprep.subr.bf16.mxu0 %v511_v0 }
  0x16   :  { %470 = vmatprep.subr.bf16.mxu1 %v511_v0 }
  0x18   :  { %490 = vmatpush3.bf16.msra.mxu0 %v489_v44 }
  0x19   :  { %472 = vmatpush3.bf16.msra.mxu1 %v471_v26  ;;  %491 = vmatprep.subr.bf16.mxu0 %v511_v0 }
  0x1a   :  { %473 = vmatprep.subr.bf16.mxu1 %v511_v0 }
  0x1c   :  { %493 = vmatpush3.bf16.msra.mxu0 %v492_v47 }
  0x1d   :  { %475 = vmatpush3.bf16.msra.mxu1 %v474_v29  ;;  %494 = vmatprep.subr.bf16.mxu0 %v511_v0 }
  0x1e   :  { %476 = vmatprep.subr.bf16.mxu1 %v511_v0 }
  0x20   :  { %496 = vmatpush3.bf16.msra.mxu0 %v495_v50 }
  0x21   :  { %478 = vmatpush3.bf16.msra.mxu1 %v477_v32  ;;  %497 = vmatprep.subr.bf16.mxu0 %v511_v0 }
  0x24   :  { %499 = vmatpush3.bf16.msra.mxu0 %v498_v53 }
  0x25   :  { %500 = vmatprep.subr.bf16.mxu0 %v511_v0 }
  0x28   :  { %502 = vmatpush3.bf16.msra.mxu0 %v501_v61 }
  0xde   :  { %v108_v55 = vpop.f32.mrb[0].mxu0 }
  0xdf   :  { %v109_v56 = vadd.f32 %v324_v54, %v108_v55  ;;  %v378_v57 = vpop.f32.mrb[1].mxu0 }
  0xe1   :  { %v112_v58 = vmax.f32 %v109_v56, 0.0 }
  0xe3   :  { %412 = vmatmul.mubr.f32.vlgmr.msra.gmra.mrb[0].mxu1 %v112_v58 }
 0x1b6   :  { %v202_v63 = vpop.f32.mrb[0].mxu1 }
 0x1b7   :  { %v203_v0 = vadd.f32 %v326_v62, %v202_v63  ;;  %v413_v1 = vpop.f32.mrb[1].mxu1 }
 0x1b9   :  { %v206_v2 = vmax.f32 %v203_v0, 0.0 }
 0x1bb   :  { %447 = vmatmul.mubr.f32.vlgmr.msra.gmra.mrb[2].mxu0 %v206_v2 }
 0x28e   :  { %v296_v7 = vpop.f32.mrb[2].mxu0 }
 0x28f   :  { %v297_v11 = vadd.f32 %v327_v6, %v296_v7  ;;  %v448_v12 = vpop.f32.mrb[3].mxu0 }
 0x291   :  { %v317_v13 = vmul.f32 %v328_v8, %v297_v11  ;;  %v307_v14 = vadd.f32 %v303_v10, %v297_v11 }
 0x293   :  { %308 = vmax.xlane.f32.xlu0 %v307_v14 }
 0x320   :  { %v309_v15 = vpop.xlane.xlu0 %308 }
 0x321   :  { %v310_v16 = vsub.f32 %v307_v14, %v309_v15 }
 0x323   :  { %v311_v17 = vmul.f32 1.442695, %v310_v16 }
 0x325   :  { %507 = vpow2.f32 %v311_v17 }
 0x32f   :  { %v508_v18 = vpop.eup %507 }
 0x330   :  { %313 = vadd.xlane.f32.xlu0 %v508_v18 }
 0x3bd   :  { %v314_v19 = vpop.xlane.xlu0 %313 }
 0x3be   :  { %509 = vrcp.f32 %v314_v19 }
 0x3c8   :  { %v510_v20 = vpop.eup %509 }
 0x3c9   :  { %v316_v21 = vmul.f32 %v510_v20, %v508_v18 }
 0x3cb   :  { %v318_v22 = vadd.f32 %v317_v13, %v316_v21 }
 0x3cd   :  { %319 = vst [vmem:[%s710_s7] sm:$0xff] %v318_v22 }

</bundles_post_ra>
